<compile_context>
chip_gen: v7x
topology: tpu7x:2x2x1
jax: 0.10.0
libtpu: 0.0.40
codegen_flags: <defaults>
</compile_context>

<pallas_src>
import functools

import jax
import jax.numpy as jnp
from jax.experimental import pallas as pl
from jax.experimental.pallas import tpu as pltpu

_LANE = 128
_NEG_FILL = -1e30  # pad value for V lanes: never the max, exp() underflows to 0


# ---------------------------------------------------------------------------
# Kernels
# ---------------------------------------------------------------------------
def _soft_kernel(logits_ref, u_ref, out_ref, *, inv_temp):
    # logits_ref / u_ref / out_ref are all (ts, Vp) — leading batch dim squeezed.
    scores = logits_ref[...].astype(jnp.float32) + u_ref[...].astype(jnp.float32)
    if inv_temp != 1.0:
        scores = scores * inv_temp
    m = jnp.max(scores, axis=-1, keepdims=True)
    e = jnp.exp(scores - m)
    s = jnp.sum(e, axis=-1, keepdims=True)
    # EUP reciprocal + one Newton refinement: keeps the divide off the VALU
    # (free slot in an HBM-bound kernel) but restores ~f32 accuracy so rows
    # sum to 1 within normal rounding.
    r = pl.reciprocal(s, approx=True)
    r = r * (2.0 - s * r)
    out_ref[...] = (e * r).astype(out_ref.dtype)


def _hard_kernel(logits_ref, u_ref, out_ref):
    # argmax of softmax(scores / T) == argmax of scores, so skip exp/sum/div
    # and the temperature scaling entirely.
    scores = logits_ref[...].astype(jnp.float32) + u_ref[...].astype(jnp.float32)
    m = jnp.max(scores, axis=-1, keepdims=True)
    V = scores.shape[-1]
    idx = jax.lax.broadcasted_iota(jnp.int32, scores.shape, scores.ndim - 1)
    # ~(scores < m) is True at the max lanes *and* at NaN lanes (comparisons
    # with NaN are False), so NaN rows pick the first NaN index (torch-like)
    # instead of producing an all-zero row.  Padded lanes (-1e30) never win.
    is_max = jnp.logical_not(scores < m)
    first_idx = jnp.min(jnp.where(is_max, idx, V), axis=-1, keepdims=True)
    out_ref[...] = jnp.where(idx == first_idx, 1.0, 0.0).astype(out_ref.dtype)


# ---------------------------------------------------------------------------
# Generation-aware sizing helpers
# ---------------------------------------------------------------------------
def _round_up(x, m):
    return ((x + m - 1) // m) * m


def _tpu_defaults():
    """Per-generation tile target and VMEM cap (with safe fallbacks)."""
    kind = ""
    try:
        kind = jax.devices()[0].device_kind.lower()
    except Exception:
        pass
    if "v7" in kind:
        # Fast HBM -> bigger tiles; only 64 MiB VMEM/core -> leave headroom.
        return {"target_bytes": 5 << 20, "vmem_cap": 48 << 20}
    if "v6" in kind:
        return {"target_bytes": 4 << 20, "vmem_cap": 96 << 20}
    if "v5" in kind:
        return {"target_bytes": 2 << 20, "vmem_cap": 96 << 20}
    # Unknown generation: probe physical VMEM if possible, else conservative.
    try:
        if pltpu.get_tpu_info().vmem_capacity_bytes >= (96 << 20):
            return {"target_bytes": 4 << 20, "vmem_cap": 96 << 20}
    except Exception:
        pass
    return {"target_bytes": 2 << 20, "vmem_cap": 48 << 20}


def _block_footprint_bytes(ts, Vp, in_item, u_item, out_item):
    blk = ts * Vp
    # double-buffered logits + out + u, plus ~2 f32 intermediates (scores/exp).
    return blk * (2 * in_item + 2 * out_item + 2 * u_item + 2 * 4)


def _pick_seq_tile(S_pad, Vp, align, in_item, u_item, out_item,
                   target_bytes, vmem_cap, want_two_steps):
    """Largest ts dividing S_pad, multiple of `align`, within target/VMEM."""
    candidates = [ts for ts in range(align, S_pad + 1, align) if S_pad % ts == 0]
    if want_two_steps:
        # B == 1: keep >= 2 grid steps on the seq axis so both v7x TCs get work.
        split = [ts for ts in candidates if S_pad // ts >= 2]
        if split:
            candidates = split
    fitting = [
        ts for ts in candidates
        if ts * Vp * in_item <= target_bytes
        and _block_footprint_bytes(ts, Vp, in_item, u_item, out_item)
        <= int(vmem_cap * 0.75)
    ]
    if fitting:
        return max(fitting)
    # Nothing meets the target: take the smallest tile that fits the VMEM cap.
    # TODO(synk): for huge V (full-V row block of many MiB, e.g. 256K-vocab f32
    # on v7x) an online-softmax variant with an "arbitrary" V grid axis would
    # bound VMEM independently of V.
    small = [
        ts for ts in candidates
        if _block_footprint_bytes(ts, Vp, in_item, u_item, out_item)
        <= int(vmem_cap * 0.75)
    ]
    return min(small) if small else min(candidates)


# ---------------------------------------------------------------------------
# Wrapper
# ---------------------------------------------------------------------------
def gumbel_softmax(logits, u_weight, temperature=1.0, hard=False, *,
                   seq_tile=None, logits_buffers=None):
    """logits: [B, S, V], u_weight: [S, V]  ->  [B, S, V] (same dtype as logits)."""
    B, S, V = logits.shape
    assert u_weight.shape == (S, V)

    defaults = _tpu_defaults()
    out_dtype = logits.dtype
    in_item = jnp.dtype(logits.dtype).itemsize
    u_item = jnp.dtype(u_weight.dtype).itemsize
    out_item = jnp.dtype(out_dtype).itemsize

    # Sublane packing factor: f32 -> 8 rows/vreg, bf16 -> 16, int8/fp8 -> 32.
    align = max(8, 32 // max(in_item, 1))

    # Lane-dense padding of the softmax axis to a multiple of 128 (unmasked vst).
    Vp = _round_up(max(V, _LANE), _LANE)
    # Sublane padding of the seq axis instead of a full-S fallback block.
    S_pad = _round_up(S, align)

    logits_p, u_p = logits, u_weight
    if Vp != V:
        # Padded lanes get -1e30 so they never win the max and exp() -> 0.
        logits_p = jnp.pad(logits_p, ((0, 0), (0, 0), (0, Vp - V)),
                           constant_values=_NEG_FILL)
        u_p = jnp.pad(u_p, ((0, 0), (0, Vp - V)))
    if S_pad != S:
        # Padded rows are all-zero -> finite (uniform) softmax, sliced away below.
        logits_p = jnp.pad(logits_p, ((0, 0), (0, S_pad - S), (0, 0)))
        u_p = jnp.pad(u_p, ((0, S_pad - S), (0, 0)))

    if seq_tile is None:
        ts = _pick_seq_tile(S_pad, Vp, align, in_item, u_item, out_item,
                            defaults["target_bytes"], defaults["vmem_cap"],
                            want_two_steps=(B == 1))
    else:
        ts = seq_tile
    assert S_pad % ts == 0

    if hard:
        kernel = _hard_kernel
    else:
        kernel = functools.partial(_soft_kernel, inv_temp=float(1.0 / temperature))

    # VMEM budget: footprint * 1.5 headroom, capped per generation (never the
    # full 64 MiB on v7x so Mosaic keeps room for internal scratch/semaphores).
    need = _block_footprint_bytes(ts, Vp, in_item, u_item, out_item)
    vmem_limit = int(min(max(int(need * 1.5), 32 << 20), defaults["vmem_cap"]))

    total = B * S_pad * Vp
    cost = pl.CostEstimate(
        flops=6 * total,
        transcendentals=0 if hard else total,
        bytes_accessed=total * in_item + S_pad * Vp * u_item + total * out_item,
    )

    # Optional deeper input pipelining (v7x: only if a profile shows exposed DMA).
    logits_spec_kwargs = {}
    if logits_buffers is not None:
        logits_spec_kwargs["pipeline_mode"] = pl.Buffered(logits_buffers)

    # Grid is (seq_tiles, batch): the inner (fastest) axis is B, and u_weight's
    # block index only depends on the seq tile, so its DMA is skipped for the
    # B-1 inner repeats. Both axes are independent -> "parallel" for megacore.
    out_p = pl.pallas_call(
        kernel,
        out_shape=jax.ShapeDtypeStruct((B, S_pad, Vp), out_dtype),
        grid_spec=pltpu.PrefetchScalarGridSpec(
            num_scalar_prefetch=0,
            grid=(S_pad // ts, B),
            in_specs=[
                pl.BlockSpec((None, ts, Vp), lambda s, b: (b, s, 0),
                             **logits_spec_kwargs),                    # logits
                pl.BlockSpec((ts, Vp), lambda s, b: (s, 0)),           # u (reused over b)
            ],
            out_specs=pl.BlockSpec((None, ts, Vp), lambda s, b: (b, s, 0)),
        ),
        compiler_params=pltpu.CompilerParams(
            dimension_semantics=("parallel", "parallel"),
            vmem_limit_bytes=vmem_limit,
        ),
        cost_estimate=cost,
    )(logits_p, u_p)

    if Vp != V or S_pad != S:
        out_p = out_p[:, :S, :V]
    return out_p


# ---------------------------------------------------------------------------
# Self-test
# ---------------------------------------------------------------------------
if __name__ == "__main__":
    key = jax.random.PRNGKey(0)
    k1, k2, k3, k4 = jax.random.split(key, 4)

    # --- Case 1: lane-aligned vocab, B > 1, f32 ---
    B, S, V = 2, 8, 128
    logits = jax.random.normal(k1, (B, S, V), dtype=jnp.float32)
    u_weight = jax.random.normal(k2, (S, V), dtype=jnp.float32)
    scores = logits + u_weight[None]

    # soft, T = 1 (specialized: no scale multiply)
    y_soft = jax.block_until_ready(gumbel_softmax(logits, u_weight, 1.0, hard=False))
    ref_soft = jax.nn.softmax(scores, axis=-1)
    assert jnp.allclose(y_soft, ref_soft, atol=2e-3, rtol=2e-3), "soft T=1 mismatch"

    # soft, T != 1 (exercises inv_temp path)
    temp = 0.5
    y_t = jax.block_until_ready(gumbel_softmax(logits, u_weight, temp, hard=False))
    ref_t = jax.nn.softmax(scores / temp, axis=-1)
    assert jnp.allclose(y_t, ref_t, atol=2e-3, rtol=2e-3), "soft T=0.5 mismatch"

    # hard (forward value = one-hot of argmax)
    y_hard = jax.block_until_ready(gumbel_softmax(logits, u_weight, 1.0, hard=True))
    ref_hard = jax.nn.one_hot(jnp.argmax(scores, axis=-1), V, dtype=jnp.float32)
    assert jnp.allclose(y_hard, ref_hard), "hard mismatch"

    # --- Case 2: unaligned small vocab/seq (V->128, S->align padding), B==1, bf16 ---
    B2, S2, V2 = 1, 10, 50
    logits2 = jax.random.normal(k3, (B2, S2, V2), dtype=jnp.bfloat16)
    u2 = jax.random.normal(k4, (S2, V2), dtype=jnp.bfloat16)
    scores2 = logits2.astype(jnp.float32) + u2.astype(jnp.float32)[None]

    y2 = jax.block_until_ready(gumbel_softmax(logits2, u2, 0.7, hard=False))
    ref2 = jax.nn.softmax(scores2 / 0.7, axis=-1)
    assert y2.shape == (B2, S2, V2) and y2.dtype == jnp.bfloat16
    assert jnp.allclose(y2.astype(jnp.float32), ref2, atol=2e-2, rtol=2e-2), \
        "soft bf16 padded mismatch"

    y2h = jax.block_until_ready(gumbel_softmax(logits2, u2, 0.7, hard=True))
    y2h_f = y2h.astype(jnp.float32)
    # one-hot rows whose selected index attains the row max (tie-break agnostic)
    assert jnp.allclose(jnp.sum(y2h_f, axis=-1), 1.0), "hard padded: not one-hot"
    sel = jnp.argmax(y2h_f, axis=-1)
    picked = jnp.take_along_axis(scores2, sel[..., None], axis=-1)[..., 0]
    assert jnp.allclose(picked, jnp.max(scores2, axis=-1)), "hard padded: not argmax"

    print("KERNEL_OK")
</pallas_src>

<mosaic_0001>
module attributes {stable_mosaic.version = 11 : i64} {
  func.func @_soft_kernel(%arg0: i32, %arg1: i32, %arg2: memref<1x8x128xf32, #tpu.memory_space<vmem>>, %arg3: memref<8x128xf32, #tpu.memory_space<vmem>>, %arg4: memref<1x8x128xf32, #tpu.memory_space<vmem>>) attributes {dimension_semantics = [#tpu.dimension_semantics<parallel>, #tpu.dimension_semantics<parallel>], iteration_bounds = array<i64: 1, 2>, scalar_prefetch = 0 : i64, scratch_operands = 0 : i64, tpu.core_type = #tpu.core_type<tc>, window_params = [{transform_indices = @transform_0, window_bounds = array<i64: 1, 8, 128>}, {transform_indices = @transform_1, window_bounds = array<i64: 8, 128>}, {transform_indices = @transform_2, window_bounds = array<i64: 1, 8, 128>}]} {
    %c0 = arith.constant 0 : index
    %c0_0 = arith.constant 0 : index
    %c0_1 = arith.constant 0 : index
    %0 = vector.load %arg2[%c0, %c0_0, %c0_1] : memref<1x8x128xf32, #tpu.memory_space<vmem>>, vector<1x8x128xf32>
    %1 = vector.shape_cast %0 : vector<1x8x128xf32> to vector<8x128xf32>
    %c0_2 = arith.constant 0 : index
    %c0_3 = arith.constant 0 : index
    %2 = vector.load %arg3[%c0_2, %c0_3] : memref<8x128xf32, #tpu.memory_space<vmem>>, vector<8x128xf32>
    %3 = arith.addf %1, %2 : vector<8x128xf32>
    %cst = arith.constant dense<0xFF800000> : vector<8xf32>
    %4 = vector.multi_reduction <maximumf>, %3, %cst [1] : vector<8x128xf32> to vector<8xf32>
    %5 = vector.shape_cast %4 : vector<8xf32> to vector<8x1xf32>
    %6 = vector.broadcast %5 : vector<8x1xf32> to vector<8x128xf32>
    %7 = arith.subf %3, %6 : vector<8x128xf32>
    %8 = math.exp %7 : vector<8x128xf32>
    %cst_4 = arith.constant dense<0.000000e+00> : vector<8xf32>
    %9 = vector.multi_reduction <add>, %8, %cst_4 [1] : vector<8x128xf32> to vector<8xf32>
    %10 = vector.shape_cast %9 : vector<8xf32> to vector<8x1xf32>
    %11 = tpu.reciprocal %10 {approx = true} : vector<8x1xf32> -> vector<8x1xf32>
    %12 = arith.mulf %10, %11 : vector<8x1xf32>
    %cst_5 = arith.constant 2.000000e+00 : f32
    %13 = vector.broadcast %cst_5 : f32 to vector<8x1xf32>
    %14 = arith.subf %13, %12 : vector<8x1xf32>
    %15 = arith.mulf %11, %14 : vector<8x1xf32>
    %16 = vector.broadcast %15 : vector<8x1xf32> to vector<8x128xf32>
    %17 = arith.mulf %8, %16 : vector<8x128xf32>
    %c0_6 = arith.constant 0 : index
    %c0_7 = arith.constant 0 : index
    %c0_8 = arith.constant 0 : index
    %18 = vector.load %arg4[%c0_6, %c0_7, %c0_8] : memref<1x8x128xf32, #tpu.memory_space<vmem>>, vector<1x8x128xf32>
    %19 = vector.shape_cast %18 : vector<1x8x128xf32> to vector<8x128xf32>
    %20 = vector.shape_cast %17 : vector<8x128xf32> to vector<1x8x128xf32>
    tpu.vector_store %arg4[%c0_6, %c0_7, %c0_8], %20 {strides = array<i32>} : memref<1x8x128xf32, #tpu.memory_space<vmem>>, vector<1x8x128xf32>,
    return
  }
  func.func @transform_0(%arg0: i32, %arg1: i32) -> (i32, i32, i32) {
    %c0_i32 = arith.constant 0 : i32
    %c0_i32_0 = arith.constant 0 : i32
    return %arg1, %arg0, %c0_i32 : i32, i32, i32
  }
  func.func @transform_1(%arg0: i32, %arg1: i32) -> (i32, i32) {
    %c0_i32 = arith.constant 0 : i32
    %c0_i32_0 = arith.constant 0 : i32
    return %arg0, %c0_i32 : i32, i32
  }
  func.func @transform_2(%arg0: i32, %arg1: i32) -> (i32, i32, i32) {
    %c0_i32 = arith.constant 0 : i32
    %c0_i32_0 = arith.constant 0 : i32
    return %arg1, %arg0, %c0_i32 : i32, i32, i32
  }
}

</mosaic_0001>

<bundles_post_ra>
// kernel: tpu_custom_call.1
= control target key start
LH: loop header
LB: loop body
LE: loop exit
PB: predicated region body
PF: predicated region fallthrough
CT: control target
= control target key end

     0   :  { %7 = vsyncpa [#allocation3], 0  ;;  %s791_s0 = inlined_call_operand.hbm [shape: f32[2,8,128], index: 0, kind: input, shape index: {}]   ;;  %s792_s1 = inlined_call_operand.hbm [shape: f32[8,128], index: 1, kind: input, shape index: {}]   ;;  %s793_s2 = inlined_call_operand.hbm [shape: f32[2,8,128], index: 2, kind: output, shape index: {}]  }
   0x1   :  { %9 = vsyncpa [#allocation3 + $0x1], 0 }
   0x2   :  { %10 = vsyncpa [#allocation6], 0 }
   0x3   :  { %11 = vsyncpa [#allocation4], 0 }
   0x4   :  { %13 = vsyncpa [#allocation4 + $0x1], 0  ;;  %s575_s9 = smov 0   ;;  %s577_s10 = smov 0  }
   0x5   :  { %s579_s11 = smov 0   ;;  %s581_s12 = smov 0  }
   0x6   :  { %s583_s13 = smov 0   ;;  %s585_s14 = smov 0  }
   0x7 LB: > { %s319_s15 = sadd.s32 4294967295, %s555_s14   ;;  %s320_s16 = sadd.s32 4294967294, %s555_s14   ;;  %s555_s14 = sphi %s585_s14, %s19_s14   ;;  %s551_s13 = sphi %s583_s13, %s818_s13   ;;  %s547_s12 = sphi %s581_s12, %s817_s12   ;;  %s543_s11 = sphi %s579_s11, %s816_s11   ;;  %s539_s10 = sphi %s577_s10, %s815_s10   ;;  %s535_s9 = sphi %s575_s9, %s814_s9  }
   0x8   : > { %p53_p0 = scmp.ne.s32.totalorder %s539_s10, %s535_s9  ;;  %p609_p1 = scmp.eq.s32.totalorder %s319_s15, 0 }
   0x9   : > { %p613_p2 = scmp.eq.s32.totalorder %s319_s15, 1  ;;  %p111_p3 = scmp.eq.s32.totalorder %s320_s16, 1 }
   0xa   : > { %s798_s17 = scalar_select %p609_p1, 1, 0 }
   0xb   : > { %s799_s18 = scalar_select %p613_p2, 1, 0 }
   0xc   : > { %p619_p4 = por %p609_p1, %p53_p0  ;;  %p321_p5 = scmp.ge.s32.totalorder %s555_s14, 1 }
   0xd   : > { %p624_p6 = por %p111_p3, %p53_p0  ;;  %p118_p7 = scmp.lt.s32.totalorder %s555_s14, 3 }
   0xe   : > { %s800_s19 = scalar_select %p619_p4, 1, 0 }
   0xf   : > { %s801_s20 = scalar_select %p624_p6, 1, 0 }
  0x10   : > { %p629_p8 = pnand %p321_p5, %p118_p7  ;;  %s557_s22 = smov [#allocation5]  }
  0x11   : > { %s133_s23 = sshll.u32 %s557_s22, 4  ;;  %s28_s25 = sadd.s32 1, %s551_s13  ;;  %s134_s23 = int_to_ptr.vmem [resolvable:$true] %s133_s23 }
  0x12   : > { %s802_s21 = scalar_select %p629_p8, 1, 0 }
  0x13   : > { %p342_p10 = pneg %p629_p8  ;;  %s40_s26 = sadd.s32 1, %s543_s11 }
  0x14   : > { %p644_p12 = scmp.ge.s32.totalorder %s28_s25, 2  ;;  %s411_s30 = scalar_lea.hbm %s792_s1, 128 }
  0x15   : > { %p638_p11 = pnand %p342_p10, %p609_p1  ;;  %p412_p13 = scmp.ne.s32.totalorder %s792_s1, %s411_s30 }
  0x16   : > { %s804_s27 = scalar_select %p644_p12, 1, 0 }
  0x17   : > { %p413_p0 = pneg %p638_p11  ;;  %p418_p7 = scmp.lt.u32.totalorder %s411_s30, %s792_s1 }
  0x19   : > { %p414_p3 = pnand %p413_p0, %p412_p13 }
  0x1b   : > { %p415_p5 = pneg %p414_p3 }
  0x1d   : > { %p420_p10 = pnand %p418_p7, %p415_p5 }
  0x1f   : > { %423 = shalt.err (!%p420_p10)
}
  0x20   : > { %s424_s7 = scalar_lea.vmem %s134_s23, 128  ;;  %p432_p4 = scmp.lt.s32.totalorder %s134_s23, %s134_s23 }
  0x21   : > { %p425_p9 = scmp.ne.s32.totalorder %s134_s23, %s424_s7  ;;  %p433_p8 = scmp.lt.s32.totalorder %s424_s7, %s424_s7 }
  0x23   : > { %p427_p6 = pnand %p425_p9, %p413_p0  ;;  %p434_p2 = por %p433_p8, %p432_p4 }
  0x25   : > { %p428_p1 = pneg %p427_p6 }
  0x27   : > { %p435_p12 = pnand %p434_p2, %p428_p1 }
  0x29   : > { %438 = shalt.err (!%p435_p12)
}
  0x2a   : > { %345 = dma.hbm_to_vmem [thread:$0]  (!%p638_p11), %s792_s1, 128, %s134_s23, [#allocation6]  }
  0x2b   : > { %p805_p4 = scmp.ne.s32.totalorder %s804_s27, 0  ;;  %p47_p1 = scmp.ne.s32.totalorder %s543_s11, %s539_s10 }
  0x2c   : > { %p48_p2 = scmp.eq.s32.totalorder %s555_s14, 0  ;;  %p355_p6 = scmp.lt.s32.totalorder %s555_s14, 2 }
  0x2d   : > { %s820_s25 = smov (%p805_p4, %s28_s25), 0  ;;  %p806_p12 = scmp.ne.s32.totalorder %s799_s18, 0 }
  0x2e   : > { %s35_s16 = ssub.s32 %s551_s13, %s820_s25  ;;  %p49_p9 = por %p48_p2, %p47_p1 }
  0x2f   : > { %p38_p8 = scmp.eq.s32.totalorder %s35_s16, 0  ;;  %p676_p13 = por %p806_p12, %p47_p1 }
  0x30   : > { %s144_s24 = sand.u32 1, %s543_s11   ;;  %s325_s27 = sshll.u32 %s551_s13, 7 }
  0x31   : > { %s684_s28 = scalar_select %p38_p8, %s543_s11, %s40_s26  }
  0x32   : > { %s324_s23 = sshll.u32 %s144_s24, 3  ;;  %s690_s3 = scalar_lea.hbm %s791_s0, %s325_s27 }
  0x33   : > { %s148_s18 = scalar_lea.vmem [#allocation2], %s324_s23  ;;  %p694_p11 = pnand %p355_p6, %p49_p9 }
  0x34   : > { %s156_s4 = sshll.u32 %s148_s18, 4  ;;  %s145_s26 = scalar_lea.sflag [#allocation3], %s144_s24  ;;  %s692_s4 = int_to_ptr.vmem [resolvable:$true] %s156_s4 }
  0x35   : > { %s439_s6 = scalar_lea.hbm %s690_s3, 128  ;;  %p441_p3 = pneg %p694_p11 }
  0x36   : > { %p440_p0 = scmp.ne.s32.totalorder %s690_s3, %s439_s6  ;;  %s444_s15 = scalar_lea.hbm %s791_s0, 256 }
  0x37   : > { %p445_p10 = scmp.lt.u32.totalorder %s690_s3, %s791_s0  ;;  %p446_p4 = scmp.lt.u32.totalorder %s444_s15, %s439_s6 }
  0x38   : > { %p442_p5 = pnand %p441_p3, %p440_p0  ;;  %p448_p2 = scmp.lt.u32.totalorder %s439_s6, %s690_s3 }
  0x39   : > { %p447_p1 = por %p446_p4, %p445_p10 }
  0x3a   : > { %p443_p7 = pneg %p442_p5 }
  0x3b   : > { %p449_p6 = por %p448_p2, %p447_p1 }
  0x3d   : > { %p450_p8 = pnand %p449_p6, %p443_p7 }
  0x3f   : > { %453 = shalt.err (!%p450_p8)
}
  0x40   : > { %s454_s24 = scalar_lea.vmem %s692_s4, 128  ;;  %s558_s27 = smov [#allocation2]  }
  0x41   : > { %p455_p9 = scmp.ne.s32.totalorder %s692_s4, %s454_s24  ;;  %s459_s29 = sshll.u32 %s558_s27, 4  ;;  %s460_s29 = int_to_ptr.vmem [resolvable:$false] %s459_s29 }
  0x42   : > { %s461_s30 = scalar_lea.vmem %s460_s29, 256  ;;  %p462_p5 = scmp.lt.s32.totalorder %s692_s4, %s460_s29 }
  0x43   : > { %p457_p12 = pnand %p455_p9, %p441_p3  ;;  %p463_p10 = scmp.lt.s32.totalorder %s461_s30, %s454_s24 }
  0x45   : > { %p458_p0 = pneg %p457_p12  ;;  %p464_p4 = por %p463_p10, %p462_p5 }
  0x47   : > { %p465_p1 = pnand %p464_p4, %p458_p0 }
  0x49   : > { %468 = shalt.err (!%p465_p1)
}
  0x4a   : > { %349 = dma.hbm_to_vmem [thread:$0]  (!%p694_p11), %s690_s3, 128, %s692_s4, %s145_s26  }
  0x4b   : > { %p809_p7 = scmp.ne.s32.totalorder %s802_s21, 0 }
  0x4c   : > { %s726_s18 = sand.u32 (!%p809_p7), 1, %s539_s10   ;;  %p810_p3 = scmp.ne.s32.totalorder (!%p809_p7), %s800_s19, 0 }
  0x4d   : > { %165 = sbr.rel (%p809_p7) target bundleno = 423 (0x1a7), region = 28  ;;  %s327_s6 = sshll.u32 (!%p809_p7), %s726_s18, 3 }
  0x4e   : > { %s168_s7 = scalar_lea.sflag (!%p809_p7), [#allocation3], %s726_s18  ;;  %s171_s8 = scalar_lea.vmem (!%p809_p7), [#allocation2], %s327_s6 }
  0x54   : > { %522 = dma.done.wait (%p810_p3), %s168_s7, 128  }
  0x55   : > { %524 = vsyncadd (%p810_p3), %s168_s7, 4294967168  ;;  %p811_p2 = scmp.ne.s32.totalorder %s798_s17, 0 }
  0x57   : > { %526 = dma.done.wait (%p811_p2), [#allocation6], 128  }
  0x58   : > { %528 = vsyncadd (%p811_p2), [#allocation6], 4294967168  ;;  %v196_v0 = vld [vmem:[%s171_s8] sm:$0xff]  ;;  %v197_v1 = vld [vmem:[#allocation5] sm:$0xff]  ;;  %s331_s17 = sshll.u32 %s547_s12, 7  ;;  %s195_s19 = scalar_lea.vmem [#allocation7], %s327_s6 }
  0x59   : > { %v198_v2 = vadd.f32 %v197_v1, %v196_v0  ;;  %s227_s21 = sshll.u32 %s195_s19, 4  ;;  %s742_s5 = scalar_lea.hbm %s793_s2, %s331_s17  ;;  %s744_s21 = int_to_ptr.vmem [resolvable:$true] %s227_s21 }
  0x5a   : > { %s213_s26 = scalar_lea.sflag [#allocation4], %s726_s18  ;;  %s469_s15 = scalar_lea.vmem %s744_s21, 128 }
  0x5b   : > { %199 = vmax.xlane.f32.xlu0 %v198_v2  ;;  %p470_p11 = scmp.ne.s32.totalorder %s744_s21, %s469_s15  ;;  %s559_s12 = smov [#allocation7]  }
  0x5c   : > { %s473_s16 = sshll.u32 %s559_s12, 4  ;;  %s474_s16 = int_to_ptr.vmem [resolvable:$false] %s473_s16 }
  0x5d   : > { %p471_p6 = pnand %p470_p11, %p676_p13  ;;  %s475_s23 = scalar_lea.vmem %s474_s16, 256 }
  0x5e   : > { %p476_p9 = scmp.lt.s32.totalorder %s744_s21, %s474_s16  ;;  %p477_p12 = scmp.lt.s32.totalorder %s475_s23, %s469_s15 }
  0x5f   : > { %p472_p8 = pneg %p471_p6 }
  0x60   : > { %p478_p0 = por %p477_p12, %p476_p9 }
  0x62   : > { %p479_p5 = pnand %p478_p0, %p472_p8 }
  0xe8   : > { %v200_v3 = vpop.xlane.xlu0 %199 }
  0xe9   : > { %v201_v4 = vsub.f32 %v198_v2, %v200_v3 }
  0xeb   : > { %v202_v5 = vmul.f32 1.442695, %v201_v4 }
  0xed   : > { %407 = vpow2.f32 %v202_v5 }
  0xf7   : > { %v408_v6 = vpop.eup %407 }
  0xf8   : > { %204 = vadd.xlane.f32.xlu0 %v408_v6 }
 0x185   : > { %v205_v7 = vpop.xlane.xlu0 %204 }
 0x186   : > { %409 = vrcp.f32 %v205_v7 }
 0x190   : > { %v410_v8 = vpop.eup %409 }
 0x191   : > { %v207_v9 = vmul.f32 %v410_v8, %v205_v7 }
 0x193   : > { %v208_v10 = vsub.f32 2.0, %v207_v9 }
 0x195   : > { %v209_v11 = vmul.f32 %v410_v8, %v208_v10 }
 0x197   : > { %v210_v12 = vmul.f32 %v408_v6, %v209_v11 }
 0x199   : > { %211 = vst [vmem:[%s195_s19] sm:$0xff] %v210_v12 }
 0x19a   : > { %482 = shalt.err (!%p479_p5)
}
 0x19b   : > { %s483_s24 = scalar_lea.hbm %s742_s5, 128  ;;  %s487_s30 = scalar_lea.hbm %s793_s2, 256 }
 0x19c   : > { %p484_p10 = scmp.ne.s32.totalorder %s742_s5, %s483_s24  ;;  %p488_p7 = scmp.lt.u32.totalorder %s742_s5, %s793_s2 }
 0x19d   : > { %p489_p3 = scmp.lt.u32.totalorder %s487_s30, %s483_s24  ;;  %p491_p11 = scmp.lt.u32.totalorder %s483_s24, %s742_s5 }
 0x19e   : > { %p485_p4 = pnand %p484_p10, %p676_p13 }
 0x19f   : > { %p490_p2 = por %p489_p3, %p488_p7 }
 0x1a0   : > { %p486_p1 = pneg %p485_p4 }
 0x1a1   : > { %p492_p6 = por %p491_p11, %p490_p2 }
 0x1a3   : > { %p493_p8 = pnand %p492_p6, %p486_p1 }
 0x1a5   : > { %496 = shalt.err (!%p493_p8)
}
 0x1a6   : > { %340 = dma.vmem_to_hbm [thread:$0]  (%p676_p13), %s744_s21, 128, %s742_s5, %s213_s26  }
 0x1a7 PF: > { %s239_s7 = sand.u32 1, %s535_s9   ;;  %p812_p9 = scmp.ne.s32.totalorder %s801_s20, 0 }
 0x1a8   : > { %p813_p12 = scmp.ge.s32.totalorder %s555_s14, 2  ;;  %s240_s8 = scalar_lea.sflag [#allocation4], %s239_s7 }
 0x1aa   : > { %p351_p0 = pnand %p813_p12, %p812_p9 }
 0x1ac   : > { %530 = dma.done.wait (!%p351_p0), %s240_s8, 128  }
 0x1ad   : > { %532 = vsyncadd (!%p351_p0), %s240_s8, 4294967168  ;;  %s19_s14 = sadd.s32 1, %s555_s14   ;;  %s814_s9 = smov %s539_s10 }
 0x1ae   : > { %p16_p5 = scmp.ge.s32.totalorder %s19_s14, 4   ;;  %s815_s10 = smov %s543_s11 }
 0x1af   : > { %s816_s11 = smov %s684_s28  ;;  %s817_s12 = smov %s551_s13 }
 0x1b0   : > { %s818_s13 = smov %s820_s25  ;;  %18 = sbr.rel (!%p16_p5) target bundleno = 7 (0x7), region = 78 }
 0x1b7   :  { %245 = vsyncpa [#allocation3], 1 }
 0x1b8   :  { %247 = vsyncpa [#allocation3 + $0x1], 1 }
 0x1b9   :  { %248 = vsyncpa [#allocation6], 1 }
 0x1ba   :  { %249 = vsyncpa [#allocation4], 1 }
 0x1bb   :  { %251 = vsyncpa [#allocation4 + $0x1], 1 }

</bundles_post_ra>
